<compile_context>
chip_gen: v5e
topology: v5e:2x2
jax: 0.10.0
libtpu: 0.0.40
codegen_flags: <defaults>
</compile_context>

<pallas_src>
import jax
import jax.numpy as jnp
from jax.experimental import pallas as pl
from jax.experimental.pallas import tpu as pltpu


_LANES = 128          # lane width of a vreg
_TILE_R = 512         # sublane rows per grid step (256 KiB f32 tile)
_FAST_PATH_MAX_ELEMS = 1 << 18   # <= 1 MiB f32 per operand -> single gridless call


# ----------------------------------------------------------------------------
# Small / launch-bound path: one call, no grid, whole operands VMEM resident.
# ----------------------------------------------------------------------------
def _myloss_small_kernel(probs_ref, pos_ref, neg_ref, loss_ref):
    """probs/pos/neg: full arrays in VMEM.  loss_ref: (1, 1) f32 in SMEM."""
    p = jnp.clip(probs_ref[...].astype(jnp.float32), 1e-7, 1.0 - 1e-7)
    pos = pos_ref[...].astype(jnp.float32)
    neg = neg_ref[...].astype(jnp.float32)

    # elementwise BCE terms (VPU + EUP only)
    ell = -(pos * jnp.log(p) + neg * jnp.log(1.0 - p))

    # (loss / (sum(pos) + sum(neg))).sum() == sum(loss) / sum(pos + neg)
    # NOTE: denom == 0 yields NaN/Inf, identical to the PyTorch reference.
    loss_ref[0, 0] = jnp.sum(ell) / jnp.sum(pos + neg)


def _my_loss_small(probs, positive, negative):
    def as2d(a):
        # Pass >=2-D arrays straight through (zero wrapper-side copies);
        # only lift 0-D / 1-D inputs to a lane-major row.
        return a if a.ndim >= 2 else a.reshape(1, -1)

    n = probs.size
    loss = pl.pallas_call(
        _myloss_small_kernel,
        out_shape=jax.ShapeDtypeStruct((1, 1), jnp.float32),
        in_specs=[
            pl.BlockSpec(memory_space=pltpu.MemorySpace.VMEM),
            pl.BlockSpec(memory_space=pltpu.MemorySpace.VMEM),
            pl.BlockSpec(memory_space=pltpu.MemorySpace.VMEM),
        ],
        out_specs=pl.BlockSpec(memory_space=pltpu.MemorySpace.SMEM),
        cost_estimate=pl.CostEstimate(
            flops=7 * n,
            transcendentals=2 * n,
            bytes_accessed=n * (probs.dtype.itemsize
                                + positive.dtype.itemsize
                                + negative.dtype.itemsize) + 4,
        ),
    )(as2d(probs), as2d(positive), as2d(negative))
    return loss[0, 0]


# ----------------------------------------------------------------------------
# Large / bandwidth-bound path: 1-D accumulation grid over (512, 128) tiles.
# ----------------------------------------------------------------------------
def _myloss_tiled_kernel(probs_ref, pos_ref, neg_ref, loss_ref, num_ref, den_ref):
    """probs/pos/neg: (TILE_R, 128) tiles.  loss_ref: (1,1) out.  num/den: (1,1) VMEM scratch."""
    step = pl.program_id(0)

    @pl.when(step == 0)
    def _():
        num_ref[...] = jnp.zeros_like(num_ref)
        den_ref[...] = jnp.zeros_like(den_ref)

    p = jnp.clip(probs_ref[...].astype(jnp.float32), 1e-7, 1.0 - 1e-7)
    pos = pos_ref[...].astype(jnp.float32)
    neg = neg_ref[...].astype(jnp.float32)

    ell = -(pos * jnp.log(p) + neg * jnp.log(1.0 - p))

    num_ref[...] += jnp.sum(ell, keepdims=True)
    den_ref[...] += jnp.sum(pos + neg, keepdims=True)

    @pl.when(step == pl.num_programs(0) - 1)
    def _():
        loss_ref[...] = num_ref[...] / den_ref[...]


def _my_loss_tiled(probs, positive, negative):
    n = probs.size
    rows = pl.cdiv(n, _LANES)
    rows_pad = pl.cdiv(rows, _TILE_R) * _TILE_R
    total = rows_pad * _LANES

    def prep(a):
        a = a.reshape(-1)
        if total != n:
            # zero padding: pos = neg = 0 there -> contributes 0 to numerator
            # and denominator; probs pad is clamped so no 0 * inf NaNs.
            a = jnp.pad(a, (0, total - n))
        return a.reshape(rows_pad, _LANES)

    loss = pl.pallas_call(
        _myloss_tiled_kernel,
        out_shape=jax.ShapeDtypeStruct((1, 1), jnp.float32),
        grid=(rows_pad // _TILE_R,),
        in_specs=[
            pl.BlockSpec((_TILE_R, _LANES), lambda i: (i, 0)),
            pl.BlockSpec((_TILE_R, _LANES), lambda i: (i, 0)),
            pl.BlockSpec((_TILE_R, _LANES), lambda i: (i, 0)),
        ],
        out_specs=pl.BlockSpec((1, 1), lambda i: (0, 0)),
        scratch_shapes=[
            pltpu.VMEM((1, 1), jnp.float32),   # numerator accumulator
            pltpu.VMEM((1, 1), jnp.float32),   # denominator accumulator
        ],
        compiler_params=pltpu.CompilerParams(
            dimension_semantics=("arbitrary",)),
        cost_estimate=pl.CostEstimate(
            flops=7 * n,
            transcendentals=2 * n,
            bytes_accessed=n * (probs.dtype.itemsize
                                + positive.dtype.itemsize
                                + negative.dtype.itemsize) + 4,
        ),
    )(prep(probs), prep(positive), prep(negative))
    return loss[0, 0]


@jax.jit
def my_loss(probs, positive, negative):
    """Pallas TPU implementation of myLoss.forward(probs, postive, negative)."""
    assert probs.shape == positive.shape == negative.shape
    if probs.size <= _FAST_PATH_MAX_ELEMS:
        return _my_loss_small(probs, positive, negative)
    return _my_loss_tiled(probs, positive, negative)


# ----------------------------------------------------------------------------
# Driver / self-check
# ----------------------------------------------------------------------------
if __name__ == "__main__":
    key = jax.random.PRNGKey(0)
    k1, k2, k3, k4 = jax.random.split(key, 4)

    def reference(probs, pos, neg):
        # exact PyTorch op order, in f32
        p = jnp.clip(probs.astype(jnp.float32), 1e-7, 1.0 - 1e-7)
        ell = -(pos.astype(jnp.float32) * jnp.log(p)
                + neg.astype(jnp.float32) * jnp.log(1.0 - p))
        return jnp.sum(ell / (jnp.sum(pos) + jnp.sum(neg)))

    # 1) module-sized case (batch=2, seq=8) -> gridless fast path
    B, N = 2, 8
    probs = jax.nn.sigmoid(jax.random.normal(k1, (B, N), dtype=jnp.float32))
    positive = (jax.random.uniform(k2, (B, N)) < 0.5).astype(jnp.float32)
    negative = 1.0 - positive

    loss = my_loss(probs, positive, negative)
    jax.block_until_ready(loss)
    ref = reference(probs, positive, negative)
    if not jnp.allclose(loss, ref, rtol=1e-5, atol=1e-6):
        raise AssertionError(f"small-path mismatch: pallas={float(loss)} ref={float(ref)}")

    # 2) larger ragged case -> tiled accumulation path (exercises padding + grid)
    B2, N2 = 1000, 300   # 300_000 elements, not a multiple of 512*128
    probs2 = jax.nn.sigmoid(jax.random.normal(k3, (B2, N2), dtype=jnp.float32))
    positive2 = (jax.random.uniform(k4, (B2, N2)) < 0.5).astype(jnp.float32)
    negative2 = 1.0 - positive2

    loss2 = my_loss(probs2, positive2, negative2)
    jax.block_until_ready(loss2)
    ref2 = reference(probs2, positive2, negative2)
    if not jnp.allclose(loss2, ref2, rtol=1e-4, atol=1e-5):
        raise AssertionError(f"tiled-path mismatch: pallas={float(loss2)} ref={float(ref2)}")

    print("KERNEL_OK")
</pallas_src>

<mosaic_0001>
module attributes {stable_mosaic.version = 11 : i64} {
  func.func @_myloss_small_kernel(%arg0: memref<2x8xf32, #tpu.memory_space<vmem>>, %arg1: memref<2x8xf32, #tpu.memory_space<vmem>>, %arg2: memref<2x8xf32, #tpu.memory_space<vmem>>, %arg3: memref<1x1xf32, #tpu.memory_space<smem>>) attributes {dimension_semantics = [], scalar_prefetch = 0 : i64, scratch_operands = 0 : i64, tpu.core_type = #tpu.core_type<tc>} {
    %c0 = arith.constant 0 : index
    %c0_0 = arith.constant 0 : index
    %0 = vector.load %arg0[%c0, %c0_0] : memref<2x8xf32, #tpu.memory_space<vmem>>, vector<2x8xf32>
    %cst = arith.constant 1.000000e-07 : f32
    %cst_1 = arith.constant 0.99999988 : f32
    %1 = vector.broadcast %cst : f32 to vector<2x8xf32>
    %2 = arith.maximumf %1, %0 : vector<2x8xf32>
    %3 = vector.broadcast %cst_1 : f32 to vector<2x8xf32>
    %4 = arith.minimumf %3, %2 : vector<2x8xf32>
    %c0_2 = arith.constant 0 : index
    %c0_3 = arith.constant 0 : index
    %5 = vector.load %arg1[%c0_2, %c0_3] : memref<2x8xf32, #tpu.memory_space<vmem>>, vector<2x8xf32>
    %c0_4 = arith.constant 0 : index
    %c0_5 = arith.constant 0 : index
    %6 = vector.load %arg2[%c0_4, %c0_5] : memref<2x8xf32, #tpu.memory_space<vmem>>, vector<2x8xf32>
    %7 = math.log %4 : vector<2x8xf32>
    %8 = arith.mulf %5, %7 : vector<2x8xf32>
    %cst_6 = arith.constant 1.000000e+00 : f32
    %9 = vector.broadcast %cst_6 : f32 to vector<2x8xf32>
    %10 = arith.subf %9, %4 : vector<2x8xf32>
    %11 = math.log %10 : vector<2x8xf32>
    %12 = arith.mulf %6, %11 : vector<2x8xf32>
    %13 = arith.addf %8, %12 : vector<2x8xf32>
    %cst_7 = arith.constant 0.000000e+00 : f32
    %14 = vector.broadcast %cst_7 : f32 to vector<2x8xf32>
    %15 = arith.subf %14, %13 : vector<2x8xf32>
    %16 = vector.shape_cast %15 : vector<2x8xf32> to vector<1x2x8xf32>
    %cst_8 = arith.constant dense<0.000000e+00> : vector<1xf32>
    %17 = vector.multi_reduction <add>, %16, %cst_8 [1, 2] : vector<1x2x8xf32> to vector<1xf32>
    %18 = vector.shape_cast %17 : vector<1xf32> to vector<1x1x1xf32>
    %19 = vector.extract %18[0, 0, 0] : f32 from vector<1x1x1xf32>
    %20 = arith.addf %5, %6 : vector<2x8xf32>
    %21 = vector.shape_cast %20 : vector<2x8xf32> to vector<1x2x8xf32>
    %cst_9 = arith.constant dense<0.000000e+00> : vector<1xf32>
    %22 = vector.multi_reduction <add>, %21, %cst_9 [1, 2] : vector<1x2x8xf32> to vector<1xf32>
    %23 = vector.shape_cast %22 : vector<1xf32> to vector<1x1x1xf32>
    %24 = vector.extract %23[0, 0, 0] : f32 from vector<1x1x1xf32>
    %25 = arith.divf %19, %24 : f32
    %c0_10 = arith.constant 0 : index
    %c0_11 = arith.constant 0 : index
    %26 = memref.load %arg3[%c0_10, %c0_11] : memref<1x1xf32, #tpu.memory_space<smem>>
    memref.store %25, %arg3[%c0_10, %c0_11] : memref<1x1xf32, #tpu.memory_space<smem>>
    return
  }
}

</mosaic_0001>

<bundles_post_ra>
// kernel: my_loss.1
= control target key start
LH: loop header
LB: loop body
LE: loop exit
PB: predicated region body
PF: predicated region fallthrough
CT: control target
= control target key end

     0   :  { %8 = vsyncpa [#allocation3], 0  ;;  %s270_s0 = inlined_call_operand.hbm [shape: f32[2,8], index: 0, kind: input, shape index: {}]   ;;  %s271_s1 = inlined_call_operand.hbm [shape: f32[2,8], index: 1, kind: input, shape index: {}]   ;;  %s272_s2 = inlined_call_operand.hbm [shape: f32[2,8], index: 2, kind: input, shape index: {}]   ;;  %s273_s3 = inlined_call_operand.hbm [shape: f32[1,1], index: 3, kind: output, shape index: {}]  }
   0x1   :  { %9 = vsyncpa [#allocation6], 0  ;;  %s27_s14 = sshll.u32 %s271_s1, 4  ;;  %s28_s14 = int_to_ptr.hbm [resolvable:$true] %s27_s14 }
   0x2   :  { %10 = vsyncpa [#allocation4], 0  ;;  %s234_s15 = smov [#allocation5]   ;;  %s16_s19 = sshll.u32 %s270_s0, 4  ;;  %s17_s19 = int_to_ptr.hbm [resolvable:$true] %s16_s19 }
   0x3   :  { %s29_s16 = sshll.u32 %s234_s15, 4  ;;  %s235_s20 = smov [#allocation2]   ;;  %s30_s16 = int_to_ptr.vmem [resolvable:$true] %s29_s16 }
   0x4   :  { %32 = dma.hbm_to_vmem [thread:$0]  %s28_s14, 32, %s30_s16, [#allocation6]  }
   0x5   :  { %s18_s21 = sshll.u32 %s235_s20, 4  ;;  %s38_s24 = sshll.u32 %s272_s2, 4  ;;  %s19_s21 = int_to_ptr.vmem [resolvable:$true] %s18_s21  ;;  %s39_s24 = int_to_ptr.hbm [resolvable:$true] %s38_s24 }
   0x6   :  { %21 = dma.hbm_to_vmem [thread:$0]  %s17_s19, 32, %s19_s21, [#allocation3]  }
   0x7   :  { %s236_s1 = smov [#allocation7]  }
   0x8   :  { %s40_s25 = sshll.u32 %s236_s1, 4  ;;  %s41_s25 = int_to_ptr.vmem [resolvable:$true] %s40_s25 }
   0x9   :  { %43 = dma.hbm_to_vmem [thread:$0]  %s39_s24, 32, %s41_s25, [#allocation6]  }
   0xa   :  { %228 = dma.done.wait [#allocation3], 32  }
   0xb   :  { %229 = vsyncadd [#allocation3], 4294967264 }
   0xc   :  { %230 = dma.done.wait [#allocation6], 64  }
   0xd   :  { %231 = vsyncadd [#allocation6], 4294967232  ;;  %v56_v0 = vld [vmem:[#allocation2] sm:$0x3]  ;;  %v59_v5 = vld [vmem:[#allocation5] sm:$0x3] }
   0xe   :  { %v57_v1 = vmax.f32 %v56_v0, 1e-07  ;;  %v60_v8 = vld [vmem:[#allocation7] sm:$0x3]  ;;  %vm70_vm0 = vcmask 58368   ;;  %s116_s28 = sshll.u32 %s273_s3, 4  ;;  %s117_s28 = int_to_ptr.hbm [resolvable:$true] %s116_s28 }
   0xf   :  { %v81_v15 = vadd.f32 %v60_v8, %v59_v5  ;;  %s237_s4 = smov [#allocation8]  }
  0x10   :  { %v58_v2 = vmin.f32 %v57_v1, 0.9999999 }
  0x11   :  { %v82_v16 = vsel %vm70_vm0, %v81_v15, 0.0 }
  0x12   :  { %138 = vlog2.f32 %v58_v2  ;;  %v64_v3 = vsub.f32 1.0, %v58_v2 }
  0x14   :  { %140 = vlog2.f32 %v64_v3 }
  0x18   :  { %v139_v4 = vpop.eup %138 }
  0x19   :  { %v62_v6 = vmul.f32 0.6931472, %v139_v4 }
  0x1a   :  { %v141_v7 = vpop.eup %140 }
  0x1b   :  { %v63_v9 = vmul.f32 %v62_v6, %v59_v5  ;;  %v66_v10 = vmul.f32 0.6931472, %v141_v7 }
  0x1d   :  { %v67_v11 = vmul.f32 %v66_v10, %v60_v8 }
  0x1f   :  { %v68_v12 = vadd.f32 %v67_v11, %v63_v9 }
  0x21   :  { %v69_v13 = vsub.f32 0.0, %v68_v12 }
  0x23   :  { %v71_v14 = vsel %vm70_vm0, %v69_v13, 0.0 }
  0x24   :  { %72 = vadd.xlane.f32.xlu0 %v71_v14 }
  0x2c   :  { %83 = vadd.xlane.f32.xlu0 %v82_v16 }
  0x97   :  { %v73_v17 = vpop.xlane.xlu0 %72 }
  0x98   :  { %v74_v18 = vrot.slane %v73_v17, 4 }
  0x9a   :  { %v75_v19 = vadd.f32 %v74_v18, %v73_v17 }
  0x9c   :  { %v76_v20 = vrot.slane %v75_v19, 2 }
  0x9e   :  { %v77_v21 = vadd.f32 %v76_v20, %v75_v19 }
  0x9f   :  { %v84_v22 = vpop.xlane.xlu0 %83 }
  0xa0   :  { %v85_v23 = vrot.slane %v84_v22, 4  ;;  %v78_v24 = vrot.slane %v77_v21, 1 }
  0xa2   :  { %v86_v25 = vadd.f32 %v85_v23, %v84_v22  ;;  %v79_v26 = vadd.f32 %v78_v24, %v77_v21 }
  0xa4   :  { %v87_v27 = vrot.slane %v86_v25, 2  ;;  %128 = vpush %v79_v26 }
  0xa6   :  { %v88_v28 = vadd.f32 %v87_v27, %v86_v25 }
  0xa8   :  { %v89_v29 = vrot.slane %v88_v28, 1 }
  0xaa   :  { %v90_v30 = vadd.f32 %v89_v29, %v88_v28 }
  0xac   :  { %130 = vpush %v90_v30 }
  0xd5   :  { %s129_s0 = spop %128 }
  0xdd   :  { %s131_s2 = spop %130 }
  0xde   :  { %v92_v31 = vstv %s131_s2 }
  0xdf   :  { %142 = vrcp.f32 %v92_v31  ;;  %v104_v35 = vand.u32 2147483648, %v92_v31  ;;  %v102_v37 = vand.u32 2147483647, %v92_v31  ;;  %vm98_vm2 = vweird.f32 %v92_v31 }
  0xe1   :  { %v105_v39 = vor.u32 1.1754944e-38, %v104_v35  ;;  %vm103_vm4 = vcmp.eq.f32.partialorder %v102_v37, 8.507059e+37 }
  0xe5   :  { %v143_v32 = vpop.eup %142 }
  0xe6   :  { %v94_v33 = vmul.f32 %v143_v32, %v92_v31  ;;  %vm99_vm1 = vweird.f32 %v143_v32 }
  0xe7   :  { %vm100_vm3 = vmor %vm98_vm2, %vm99_vm1 }
  0xe8   :  { %v95_v34 = vsub.f32 1.0, %v94_v33 }
  0xea   :  { %v96_v36 = vmul.f32 %v143_v32, %v95_v34 }
  0xec   :  { %v97_v38 = vadd.f32 %v143_v32, %v96_v36 }
  0xee   :  { %v101_v40 = vsel %vm100_vm3, %v143_v32, %v97_v38 }
  0xef   :  { %v106_v41 = vsel %vm103_vm4, %v105_v39, %v101_v40 }
  0xf0   :  { %132 = vpush %v106_v41 }
 0x121   :  { %s133_s29 = spop %132 }
 0x122   :  { %s108_s30 = smul.f32 %s133_s29, %s129_s0 }
 0x124   :  { %110 = sst [smem:[#allocation8]] %s108_s30 }
 0x125   :  { %119 = dma.smem_to_hbm %s237_s4, 16, %s117_s28, [#allocation4]  }
 0x126   :  { %232 = dma.done.wait [#allocation4], 16  }
 0x127   :  { %233 = vsyncadd [#allocation4], 4294967280 }
 0x128   :  { %124 = sfence }
 0x129   :  { %125 = vsyncpa [#allocation3], 1 }
 0x12a   :  { %126 = vsyncpa [#allocation6], 1 }
 0x12b   :  { %127 = vsyncpa [#allocation4], 1 }

</bundles_post_ra>
